<compile_context>
chip_gen: v5e
topology: v5e:2x2
jax: 0.10.0
libtpu: 0.0.40
codegen_flags: <defaults>
</compile_context>

<pallas_src>
import jax
import jax.numpy as jnp
from jax.experimental import pallas as pl
from jax.experimental.pallas import tpu as pltpu


def _round_up(x, m):
    return (x + m - 1) // m * m


def _conv3d_tk3_kernel(x0_ref, x1_ref, x2_ref, w_ref, b_ref, o_ref):
    # x{0,1,2}_ref : (HW_tile, 9*Cin)  im2col'd frames t, t+1, t+2 (temporally padded)
    # w_ref        : (3, 9*Cin, Cout_tile)  per-temporal-tap Conv2d GEMM weights
    # b_ref        : (1, Cout_tile)         bias, added exactly once (f32)
    # o_ref        : (HW_tile, Cout_tile)
    acc = jnp.dot(x0_ref[...], w_ref[0], preferred_element_type=jnp.float32)
    acc = acc + jnp.dot(x1_ref[...], w_ref[1], preferred_element_type=jnp.float32)
    acc = acc + jnp.dot(x2_ref[...], w_ref[2], preferred_element_type=jnp.float32)
    o_ref[...] = (acc + b_ref[...]).astype(o_ref.dtype)


def conv3d_temporal_kernel3_decomposed(x_ncthw, weight_oidhw, bias,
                                       *, compute_dtype=jnp.float32,
                                       hw_tile=512):
    """Equivalent of _Conv3dTemporalKernel3Decomposed(conv3d).forward(x).

    x_ncthw      : (N, Cin, T, H, W)
    weight_oidhw : (Cout, Cin, 3, 3, 3)
    bias         : (Cout,)
    compute_dtype: matmul operand dtype (bf16 recommended on v6e/v7x);
                   accumulation and bias epilogue stay f32.
    """
    N, Cin, T, H, W = x_ncthw.shape
    Cout = weight_oidhw.shape[0]
    assert weight_oidhw.shape == (Cout, Cin, 3, 3, 3)
    out_dtype = x_ncthw.dtype

    HW = H * W
    K = 9 * Cin
    # Tile sizes: HW rows in >=128-ish chunks (8-aligned sublanes), Cout padded
    # to a lane-dense multiple of 128 (256 tile when it divides, matching the
    # 2x256^2 MXU on v6e/v7x; 128 otherwise, which also suits v5e).
    HW_tile = min(hw_tile, _round_up(HW, 8))
    HW_pad = _round_up(HW, HW_tile)
    Cout_pad = _round_up(Cout, 128)
    Cout_tile = 256 if Cout_pad % 256 == 0 else 128

    # ------------- glue: layout transforms / spatial im2col (plain JAX) -------------
    x = jnp.transpose(x_ncthw, (0, 2, 3, 4, 1))                  # (N, T, H, W, Cin)
    # temporal zero pad of 1 (conv3d padding[0]==1) + spatial zero pad of 1
    x = jnp.pad(x, ((0, 0), (1, 1), (1, 1), (1, 1), (0, 0)))     # (N, T+2, H+2, W+2, Cin)
    cols = [x[:, :, kh:kh + H, kw:kw + W, :] for kh in range(3) for kw in range(3)]
    x_col = jnp.concatenate(cols, axis=-1).reshape(N, T + 2, HW, K)
    if HW_pad != HW:
        x_col = jnp.pad(x_col, ((0, 0), (0, 0), (0, HW_pad - HW), (0, 0)))
    x_col = x_col.astype(compute_dtype)

    # weight (Cout, Cin, kt, kh, kw) -> (kt, kh, kw, Cin, Cout) -> (3, 9*Cin, Cout_pad)
    w_col = jnp.transpose(weight_oidhw, (2, 3, 4, 1, 0)).reshape(3, K, Cout)
    if Cout_pad != Cout:
        w_col = jnp.pad(w_col, ((0, 0), (0, 0), (0, Cout_pad - Cout)))
    w_col = w_col.astype(compute_dtype)
    b2 = jnp.pad(bias.astype(jnp.float32), (0, Cout_pad - Cout)).reshape(1, Cout_pad)

    grid = (N, T, HW_pad // HW_tile, Cout_pad // Cout_tile)

    # ------------- hot path: Pallas kernel -------------
    out = pl.pallas_call(
        _conv3d_tk3_kernel,
        out_shape=jax.ShapeDtypeStruct((N, T, HW_pad, Cout_pad), out_dtype),
        grid_spec=pltpu.PrefetchScalarGridSpec(
            num_scalar_prefetch=0,
            grid=grid,
            in_specs=[
                # Three temporally shifted per-(n,t) frame windows of the SAME
                # x_col array (taps t-1, t, t+1 of the original video, via the
                # +1 temporal zero padding).  Only these tiles hit VMEM.
                pl.BlockSpec((None, None, HW_tile, K),
                             lambda n, t, h, c: (n, t, h, 0)),
                pl.BlockSpec((None, None, HW_tile, K),
                             lambda n, t, h, c: (n, t + 1, h, 0)),
                pl.BlockSpec((None, None, HW_tile, K),
                             lambda n, t, h, c: (n, t + 2, h, 0)),
                # weights: resident per Cout tile
                pl.BlockSpec((3, K, Cout_tile), lambda n, t, h, c: (0, 0, c)),
                # bias: resident per Cout tile
                pl.BlockSpec((1, Cout_tile), lambda n, t, h, c: (0, c)),
            ],
            out_specs=pl.BlockSpec((None, None, HW_tile, Cout_tile),
                                   lambda n, t, h, c: (n, t, h, c)),
        ),
        compiler_params=pltpu.CompilerParams(
            # every grid axis is independent -> shard across megacore / v7x TCs
            dimension_semantics=("parallel", "parallel", "parallel", "parallel")),
    )(x_col, x_col, x_col, w_col, b2)

    out = out[:, :, :HW, :Cout].reshape(N, T, H, W, Cout)
    return jnp.transpose(out, (0, 4, 1, 2, 3))                   # back to NCTHW


if __name__ == "__main__":
    key = jax.random.PRNGKey(0)
    kx, kw, kb = jax.random.split(key, 3)

    # small shapes consistent with the module's forward (NCTHW video tensor)
    N, Cin, Cout, T, H, W = 2, 4, 8, 4, 8, 16
    x = jax.random.normal(kx, (N, Cin, T, H, W), dtype=jnp.float32)
    weight = 0.1 * jax.random.normal(kw, (Cout, Cin, 3, 3, 3), dtype=jnp.float32)
    bias = jax.random.normal(kb, (Cout,), dtype=jnp.float32)

    # reference: the conv3d the module decomposes (identical semantics)
    ref = jax.lax.conv_general_dilated(
        x, weight,
        window_strides=(1, 1, 1),
        padding=((1, 1), (1, 1), (1, 1)),
        dimension_numbers=("NCDHW", "OIDHW", "NCDHW"),
    ) + bias[None, :, None, None, None]

    # f32 path (exact check)
    out = conv3d_temporal_kernel3_decomposed(x, weight, bias)
    out = jax.block_until_ready(out)
    assert out.shape == (N, Cout, T, H, W)
    assert jnp.allclose(out, ref, atol=1e-4, rtol=1e-4), (
        float(jnp.max(jnp.abs(out - ref))))

    # bf16 operands (v6e/v7x MXU fast path), f32 accumulation -> loose tolerance
    out_bf16 = conv3d_temporal_kernel3_decomposed(
        x, weight, bias, compute_dtype=jnp.bfloat16)
    out_bf16 = jax.block_until_ready(out_bf16)
    assert jnp.allclose(out_bf16, ref, atol=1e-1, rtol=1e-1), (
        float(jnp.max(jnp.abs(out_bf16 - ref))))

    print("KERNEL_OK")
</pallas_src>

<mosaic_0001>
module attributes {stable_mosaic.version = 11 : i64} {
  func.func @_conv3d_tk3_kernel(%arg0: i32, %arg1: i32, %arg2: i32, %arg3: i32, %arg4: memref<1x1x128x36xf32, #tpu.memory_space<vmem>>, %arg5: memref<1x1x128x36xf32, #tpu.memory_space<vmem>>, %arg6: memref<1x1x128x36xf32, #tpu.memory_space<vmem>>, %arg7: memref<3x36x128xf32, #tpu.memory_space<vmem>>, %arg8: memref<1x128xf32, #tpu.memory_space<vmem>>, %arg9: memref<1x1x128x128xf32, #tpu.memory_space<vmem>>) attributes {dimension_semantics = [#tpu.dimension_semantics<parallel>, #tpu.dimension_semantics<parallel>, #tpu.dimension_semantics<parallel>, #tpu.dimension_semantics<parallel>], iteration_bounds = array<i64: 2, 4, 1, 1>, scalar_prefetch = 0 : i64, scratch_operands = 0 : i64, tpu.core_type = #tpu.core_type<tc>, window_params = [{transform_indices = @transform_0, window_bounds = array<i64: 1, 1, 128, 36>}, {transform_indices = @transform_1, window_bounds = array<i64: 1, 1, 128, 36>}, {transform_indices = @transform_2, window_bounds = array<i64: 1, 1, 128, 36>}, {transform_indices = @transform_3, window_bounds = array<i64: 3, 36, 128>}, {transform_indices = @transform_4, window_bounds = array<i64: 1, 128>}, {transform_indices = @transform_5, window_bounds = array<i64: 1, 1, 128, 128>}]} {
    %c0 = arith.constant 0 : index
    %c0_0 = arith.constant 0 : index
    %c0_1 = arith.constant 0 : index
    %c0_2 = arith.constant 0 : index
    %0 = vector.load %arg4[%c0, %c0_0, %c0_1, %c0_2] : memref<1x1x128x36xf32, #tpu.memory_space<vmem>>, vector<1x1x128x36xf32>
    %1 = vector.shape_cast %0 : vector<1x1x128x36xf32> to vector<128x36xf32>
    %c0_3 = arith.constant 0 : index
    %c0_4 = arith.constant 0 : index
    %c0_5 = arith.constant 0 : index
    %2 = vector.load %arg7[%c0_3, %c0_4, %c0_5] : memref<3x36x128xf32, #tpu.memory_space<vmem>>, vector<1x36x128xf32>
    %3 = vector.shape_cast %2 : vector<1x36x128xf32> to vector<36x128xf32>
    %cst = arith.constant dense<0.000000e+00> : vector<128x128xf32>
    %4 = tpu.matmul %1, %3, %cst {dimension_numbers = #tpu.dot_dimension_numbers<[1], [0], [0], [1], [0, 0, 1, 1], [], []>} : vector<128x36xf32>, vector<36x128xf32>, vector<128x128xf32> -> vector<128x128xf32>
    %c0_6 = arith.constant 0 : index
    %c0_7 = arith.constant 0 : index
    %c0_8 = arith.constant 0 : index
    %c0_9 = arith.constant 0 : index
    %5 = vector.load %arg5[%c0_6, %c0_7, %c0_8, %c0_9] : memref<1x1x128x36xf32, #tpu.memory_space<vmem>>, vector<1x1x128x36xf32>
    %6 = vector.shape_cast %5 : vector<1x1x128x36xf32> to vector<128x36xf32>
    %c1 = arith.constant 1 : index
    %c0_10 = arith.constant 0 : index
    %c0_11 = arith.constant 0 : index
    %7 = vector.load %arg7[%c1, %c0_10, %c0_11] : memref<3x36x128xf32, #tpu.memory_space<vmem>>, vector<1x36x128xf32>
    %8 = vector.shape_cast %7 : vector<1x36x128xf32> to vector<36x128xf32>
    %cst_12 = arith.constant dense<0.000000e+00> : vector<128x128xf32>
    %9 = tpu.matmul %6, %8, %cst_12 {dimension_numbers = #tpu.dot_dimension_numbers<[1], [0], [0], [1], [0, 0, 1, 1], [], []>} : vector<128x36xf32>, vector<36x128xf32>, vector<128x128xf32> -> vector<128x128xf32>
    %10 = arith.addf %4, %9 : vector<128x128xf32>
    %c0_13 = arith.constant 0 : index
    %c0_14 = arith.constant 0 : index
    %c0_15 = arith.constant 0 : index
    %c0_16 = arith.constant 0 : index
    %11 = vector.load %arg6[%c0_13, %c0_14, %c0_15, %c0_16] : memref<1x1x128x36xf32, #tpu.memory_space<vmem>>, vector<1x1x128x36xf32>
    %12 = vector.shape_cast %11 : vector<1x1x128x36xf32> to vector<128x36xf32>
    %c2 = arith.constant 2 : index
    %c0_17 = arith.constant 0 : index
    %c0_18 = arith.constant 0 : index
    %13 = vector.load %arg7[%c2, %c0_17, %c0_18] : memref<3x36x128xf32, #tpu.memory_space<vmem>>, vector<1x36x128xf32>
    %14 = vector.shape_cast %13 : vector<1x36x128xf32> to vector<36x128xf32>
    %cst_19 = arith.constant dense<0.000000e+00> : vector<128x128xf32>
    %15 = tpu.matmul %12, %14, %cst_19 {dimension_numbers = #tpu.dot_dimension_numbers<[1], [0], [0], [1], [0, 0, 1, 1], [], []>} : vector<128x36xf32>, vector<36x128xf32>, vector<128x128xf32> -> vector<128x128xf32>
    %16 = arith.addf %10, %15 : vector<128x128xf32>
    %c0_20 = arith.constant 0 : index
    %c0_21 = arith.constant 0 : index
    %17 = vector.load %arg8[%c0_20, %c0_21] : memref<1x128xf32, #tpu.memory_space<vmem>>, vector<1x128xf32>
    %18 = vector.broadcast %17 : vector<1x128xf32> to vector<128x128xf32>
    %19 = arith.addf %16, %18 : vector<128x128xf32>
    %c0_22 = arith.constant 0 : index
    %c0_23 = arith.constant 0 : index
    %c0_24 = arith.constant 0 : index
    %c0_25 = arith.constant 0 : index
    %20 = vector.load %arg9[%c0_22, %c0_23, %c0_24, %c0_25] : memref<1x1x128x128xf32, #tpu.memory_space<vmem>>, vector<1x1x128x128xf32>
    %21 = vector.shape_cast %20 : vector<1x1x128x128xf32> to vector<128x128xf32>
    %22 = vector.shape_cast %19 : vector<128x128xf32> to vector<1x1x128x128xf32>
    tpu.vector_store %arg9[%c0_22, %c0_23, %c0_24, %c0_25], %22 {strides = array<i32>} : memref<1x1x128x128xf32, #tpu.memory_space<vmem>>, vector<1x1x128x128xf32>,
    return
  }
  func.func @transform_0(%arg0: i32, %arg1: i32, %arg2: i32, %arg3: i32) -> (i32, i32, i32, i32) {
    %c0_i32 = arith.constant 0 : i32
    %c0_i32_0 = arith.constant 0 : i32
    return %arg0, %arg1, %arg2, %c0_i32 : i32, i32, i32, i32
  }
  func.func @transform_1(%arg0: i32, %arg1: i32, %arg2: i32, %arg3: i32) -> (i32, i32, i32, i32) {
    %c1_i32 = arith.constant 1 : i32
    %0 = arith.addi %arg1, %c1_i32 : i32
    %c0_i32 = arith.constant 0 : i32
    %c0_i32_0 = arith.constant 0 : i32
    return %arg0, %0, %arg2, %c0_i32 : i32, i32, i32, i32
  }
  func.func @transform_2(%arg0: i32, %arg1: i32, %arg2: i32, %arg3: i32) -> (i32, i32, i32, i32) {
    %c2_i32 = arith.constant 2 : i32
    %0 = arith.addi %arg1, %c2_i32 : i32
    %c0_i32 = arith.constant 0 : i32
    %c0_i32_0 = arith.constant 0 : i32
    return %arg0, %0, %arg2, %c0_i32 : i32, i32, i32, i32
  }
  func.func @transform_3(%arg0: i32, %arg1: i32, %arg2: i32, %arg3: i32) -> (i32, i32, i32) {
    %c0_i32 = arith.constant 0 : i32
    %c0_i32_0 = arith.constant 0 : i32
    %c0_i32_1 = arith.constant 0 : i32
    return %c0_i32, %c0_i32_0, %arg3 : i32, i32, i32
  }
  func.func @transform_4(%arg0: i32, %arg1: i32, %arg2: i32, %arg3: i32) -> (i32, i32) {
    %c0_i32 = arith.constant 0 : i32
    %c0_i32_0 = arith.constant 0 : i32
    return %c0_i32, %arg3 : i32, i32
  }
  func.func @transform_5(%arg0: i32, %arg1: i32, %arg2: i32, %arg3: i32) -> (i32, i32, i32, i32) {
    %c0_i32 = arith.constant 0 : i32
    return %arg0, %arg1, %arg2, %arg3 : i32, i32, i32, i32
  }
}

</mosaic_0001>

<bundles_post_ra>
// kernel: tpu_custom_call.1
= control target key start
LH: loop header
LB: loop body
LE: loop exit
PB: predicated region body
PF: predicated region fallthrough
CT: control target
= control target key end

     0   :  { %s1758_s0 = inlined_call_operand.vmem [shape: f32[2,6,128,36], index: 0, kind: input, shape index: {}]   ;;  %s1759_s1 = inlined_call_operand.vmem [shape: f32[2,6,128,36], index: 1, kind: input, shape index: {}]   ;;  %s1760_s2 = inlined_call_operand.vmem [shape: f32[2,6,128,36], index: 2, kind: input, shape index: {}]   ;;  %s1761_s3 = inlined_call_operand.vmem [shape: f32[3,36,128], index: 3, kind: input, shape index: {}]   ;;  %s1762_s4 = inlined_call_operand.vmem [shape: f32[1,128], index: 4, kind: input, shape index: {}]   ;;  %s1763_s5 = inlined_call_operand.hbm [shape: f32[2,4,128,128], index: 5, kind: output, shape index: {}]  }
   0x1   :  { %1765 = sst [smem:[#allocation6_spill]] %s1759_s1 }
   0x2   :  { %1766 = sst [smem:[#allocation7_spill]] %s1761_s3 }
   0x3   :  { %10 = vsyncpa [#allocation3], 0 }
   0x4   :  { %12 = vsyncpa [#allocation3 + $0x1], 0  ;;  %s1390_s18 = smov 0   ;;  %s1392_s19 = smov 0  }
   0x5   :  { %s1394_s20 = smov 0   ;;  %s1396_s21 = smov 0  }
   0x6   :  { %s1398_s22 = smov 0   ;;  %s1400_s23 = smov 0  }
   0x7   :  { %s1402_s24 = smov 0   ;;  %s1404_s25 = smov 0  }
   0x8 LB: > { %s1091_s26 = sadd.s32 4294967295, %s1356_s25   ;;  %s1092_s27 = sadd.s32 4294967294, %s1356_s25   ;;  %s1356_s25 = sphi %s1404_s25, %s18_s25   ;;  %s1352_s24 = sphi %s1402_s24, %s1780_s24   ;;  %s1348_s23 = sphi %s1400_s23, %s1779_s23   ;;  %s1344_s22 = sphi %s1398_s22, %s1778_s22   ;;  %s1340_s21 = sphi %s1396_s21, %s1777_s21   ;;  %s1336_s20 = sphi %s1394_s20, %s1776_s20   ;;  %s1332_s19 = sphi %s1392_s19, %s1775_s19   ;;  %s1328_s18 = sphi %s1390_s18, %s1774_s18  }
   0x9   : > { %s40_s28 = sadd.s32 1, %s1348_s23  ;;  %s44_s29 = sadd.s32 1, %s1352_s24 }
   0xa   : > { %p42_p0 = scmp.ge.s32.totalorder %s40_s28, 4  ;;  %p213_p1 = scmp.ne.s32.totalorder %s1336_s20, %s1332_s19 }
   0xb   : > { %p214_p2 = scmp.eq.s32.totalorder %s1091_s26, 7  ;;  %p219_p5 = scmp.ne.s32.totalorder %s1332_s19, %s1328_s18 }
   0xc   : > { %s1782_s28 = smov (%p42_p0, %s40_s28), 0  ;;  %s1784_s29 = smov (!%p42_p0, %s44_s29), %s1352_s24 }
   0xd   : > { %s195_s30 = ssub.s32 %s1348_s23, %s1782_s28  ;;  %p1441_p3 = por %p214_p2, %p213_p1 }
   0xe   : > { %p46_p4 = scmp.ge.s32.totalorder %s1784_s29, 2  ;;  %p220_p6 = scmp.eq.s32.totalorder %s1092_s27, 7 }
   0xf   : > { %p1097_p7 = scmp.ge.s32.totalorder %s1356_s25, 1  ;;  %p306_p9 = scmp.lt.s32.totalorder %s1356_s25, 9 }
  0x10   : > { %s1786_s29 = smov (%p46_p4, %s1784_s29), 0  ;;  %p1450_p8 = por %p220_p6, %p219_p5 }
  0x11   : > { %1768 = sst [smem:[#allocation5_spill]] %s1786_s29  ;;  %s194_s8 = ssub.s32 %s1352_s24, %s1786_s29 }
  0x12   : > { %s203_s9 = sadd.s32 1, %s1336_s20  ;;  %s196_s10 = sor.u32 %s195_s30, %s194_s8 }
  0x13   : > { %p307_p10 = pnand %p1097_p7, %p306_p9  ;;  %p201_p11 = scmp.eq.s32.totalorder %s196_s10, 0 }
  0x14   : > { %s1770_s3 = sld [smem:[#allocation7_spill]] (!%p307_p10)  ;;  %p378_p12 = scmp.lt.s32.totalorder (!%p307_p10), %s1344_s22, 1 }
  0x15   : > { %s1459_s11 = scalar_select %p201_p11, %s1336_s20, %s203_s9  }
  0x16   : > { %310 = sbr.rel (%p307_p10) target bundleno = 267 (0x10b), region = 40  ;;  %s391_s9 = sadd.s32 (!%p307_p10), 1, %s1340_s21 }
  0x17   : > { %p395_p13 = scmp.lt.s32.totalorder (!%p307_p10), %s391_s9, 5  ;;  %s407_s17 = sadd.s32 (!%p307_p10), 2, %s1340_s21 }
  0x18   : > { %p1524_p0 = scmp.lt.s32.totalorder (!%p307_p10), %s407_s17, 5  ;;  %p380_p1 = scmp.lt.s32.totalorder (!%p307_p10), %s1340_s21, 5 }
  0x19   : > { %s1772_s1 = sld [smem:[#allocation6_spill]] (!%p307_p10) }
  0x1b   : > { %v1109_v0 = vld [vmem:[%s1770_s3 + $0x48] sm:$0xf]  ;;  %vm523_vm0 = vcmask 1043456   ;;  %v1467_v1 = vld [vmem:[%s1770_s3 + $0x70] sm:$0xf]  ;;  %v1108_v2 = vld [vmem:[%s1770_s3 + $0x40] sm:$0xff] }
  0x1c   : > { %1172 = vmatpush.msk.msra.mxu3 %vm523_vm0, %v1109_v0  ;;  %1149 = vmatpush.msk.msra.mxu2 %vm523_vm0, %v1467_v1  ;;  %v1478_v3 = vld [vmem:[%s1770_s3 + $0x68] sm:$0xff]  ;;  %v451_v4 = vld [vmem:[%s1770_s3 + $0x20] sm:$0xf]  ;;  %v1107_v5 = vld [vmem:[%s1770_s3 + $0x38] sm:$0xff]  ;;  %s379_s30 = scalar_select %p378_p12, %s1344_s22, 1  ;;  %vm474_vm1 = vcmask 293888  }
  0x1d   : > { %1110 = vmatpush.msk.msra.mxu0 %vm523_vm0, %v1109_v0  ;;  %1127 = vmatpush.msk.msra.mxu1 %vm523_vm0, %v451_v4  ;;  %v1493_v6 = vld [vmem:[%s1770_s3 + $0x60] sm:$0xff]  ;;  %v450_v7 = vld [vmem:[%s1770_s3 + $0x18] sm:$0xff]  ;;  %v449_v8 = vld [vmem:[%s1770_s3 + $0x10] sm:$0xff]  ;;  %s1788_s9 = smov (!%p395_p13, %s391_s9), 5  ;;  %s1790_s17 = smov (!%p1524_p0, %s407_s17), 5 }
  0x1e   : > { %1173 = vmatpush.msra.mxu3 %v1108_v2  ;;  %793 = vmatpush.msra.mxu2 %v1478_v3  ;;  %v1106_v9 = vld [vmem:[%s1770_s3 + $0x30] sm:$0xff]  ;;  %v1145_v10 = vld [vmem:[%s1770_s3 + $0x58] sm:$0xff]  ;;  %s1511_s14 = smul.u32 96, %s379_s30  ;;  %v448_v11 = vld [vmem:[%s1770_s3 + $0x8] sm:$0xff]  ;;  %s1101_s12 = sshll.u32 %s1788_s9, 4 }
  0x1f   : > { %539 = vmatpush.msra.mxu0 %v1108_v2  ;;  %655 = vmatpush.msra.mxu1 %v450_v7  ;;  %v1105_v12 = vld [vmem:[%s1770_s3 + $0x28] sm:$0xff]  ;;  %v1144_v13 = vld [vmem:[%s1770_s3 + $0x50] sm:$0xff]  ;;  %v447_v14 = vld [vmem:[%s1770_s3] sm:$0xff]  ;;  %s381_s10 = scalar_select %p380_p1, %s1340_s21, 5 }
  0x20   : > { %1174 = vmatpush.msra.mxu3 %v1107_v5  ;;  %794 = vmatpush.msra.mxu2 %v1493_v6  ;;  %s402_s13 = sadd.s32 %s1511_s14, %s1101_s12  ;;  %s1103_s12 = sshll.u32 %s1790_s17, 4 }
  0x21   : > { %540 = vmatpush.msra.mxu0 %v1107_v5  ;;  %656 = vmatpush.msra.mxu1 %v449_v8  ;;  %s1102_s15 = sshll.u32 %s402_s13, 3  ;;  %s418_s13 = sadd.s32 %s1511_s14, %s1103_s12 }
  0x22   : > { %1175 = vmatpush.msra.mxu3 %v1106_v9  ;;  %795 = vmatpush.msra.mxu2 %v1145_v10  ;;  %s1536_s8 = scalar_lea.vmem %s1772_s1, %s1102_s15  ;;  %s1099_s15 = sshll.u32 %s381_s10, 4 }
  0x23   : > { %541 = vmatpush.msra.mxu0 %v1106_v9  ;;  %657 = vmatpush.msra.mxu1 %v448_v11  ;;  %v464_v15 = vld [vmem:[%s1536_s8 + $0x60] sm:$0xff]  ;;  %s1104_s16 = sshll.u32 %s418_s13, 3  ;;  %s387_s26 = sadd.s32 %s1511_s14, %s1099_s15  ;;  %v465_v18 = vld [vmem:[%s1536_s8 + $0x68] sm:$0xff]  ;;  %v466_v23 = vld [vmem:[%s1536_s8 + $0x70] sm:$0xff] }
  0x24   : > { %1176 = vmatpush.msra.mxu3 %v1105_v12  ;;  %796 = vmatpush.msra.mxu2 %v1144_v13  ;;  %v452_v16 = vld [vmem:[%s1536_s8] sm:$0xff]  ;;  %s1555_s27 = scalar_lea.vmem %s1760_s2, %s1104_s16  ;;  %s1100_s1 = sshll.u32 %s387_s26, 3  ;;  %v453_v20 = vld [vmem:[%s1536_s8 + $0x8] sm:$0xff]  ;;  %v454_v24 = vld [vmem:[%s1536_s8 + $0x10] sm:$0xff] }
  0x25   : > { %542 = vmatpush.msra.mxu0 %v1105_v12  ;;  %1123 = vmatmul.msk.f32.vlgmr.msra.gmra.mxu3 %vm474_vm1, %v464_v15  ;;  %v708_v17 = vld [vmem:[%s1555_s27] sm:$0xff]  ;;  %s1561_s29 = scalar_lea.vmem %s1758_s0, %s1100_s1  ;;  %v709_v21 = vld [vmem:[%s1555_s27 + $0x8] sm:$0xff]  ;;  %v710_v25 = vld [vmem:[%s1555_s27 + $0x10] sm:$0xff]  ;;  %s374_s1 = sand.u32 1, %s1332_s19  }
  0x26   : > { %1177 = vmatpush.msk.msrb.mxu3 %vm523_vm0, %v451_v4  ;;  %658 = vmatpush.msra.mxu1 %v447_v14  ;;  %v431_v19 = vld [vmem:[%s1561_s29] sm:$0xff]  ;;  %v432_v22 = vld [vmem:[%s1561_s29 + $0x8] sm:$0xff]  ;;  %v433_v26 = vld [vmem:[%s1561_s29 + $0x10] sm:$0xff]  ;;  %s1098_s3 = sshll.u32 %s374_s1, 7  ;;  %s1167_s10 = sshll.u32 %s1340_s21, 4 }
  0x27   : > { %1111 = vmatmul.msk.f32.vlgmr.msra.gmra.mxu0 %vm474_vm1, %v452_v16  ;;  %1150 = vmatmul.msk.f32.vlgmr.msra.gmra.mxu2 %vm474_vm1, %v708_v17  ;;  %v467_v27 = vld [vmem:[%s1536_s8 + $0x78] sm:$0xff]  ;;  %v443_v31 = vld [vmem:[%s1561_s29 + $0x60] sm:$0xff]  ;;  %v444_v35 = vld [vmem:[%s1561_s29 + $0x68] sm:$0xff]  ;;  %s1168_s12 = sshll.u32 %s1344_s22, 6  ;;  %s899_s9 = scalar_lea.sflag [#allocation3], %s374_s1 }
  0x28   : > { %1178 = vmatpush.msrb.mxu3 %v450_v7  ;;  %1128 = vmatmul.msk.f32.vlgmr.msra.gmra.mxu1 %vm474_vm1, %v431_v19  ;;  %v455_v28 = vld [vmem:[%s1536_s8 + $0x18] sm:$0xff]  ;;  %v456_v32 = vld [vmem:[%s1536_s8 + $0x20] sm:$0xff]  ;;  %v457_v36 = vld [vmem:[%s1536_s8 + $0x28] sm:$0xff]  ;;  %s913_s13 = sadd.s32 %s1168_s12, %s1167_s10 }
  0x29   : > { %v711_v29 = vld [vmem:[%s1555_s27 + $0x18] sm:$0xff]  ;;  %v712_v33 = vld [vmem:[%s1555_s27 + $0x20] sm:$0xff]  ;;  %v713_v37 = vld [vmem:[%s1555_s27 + $0x28] sm:$0xff]  ;;  %s1169_s15 = sshll.u32 %s913_s13, 3 }
  0x2a   : > { %1179 = vmatpush.msrb.mxu3 %v449_v8  ;;  %v434_v30 = vld [vmem:[%s1561_s29 + $0x18] sm:$0xff]  ;;  %v435_v34 = vld [vmem:[%s1561_s29 + $0x20] sm:$0xff]  ;;  %v436_v38 = vld [vmem:[%s1561_s29 + $0x28] sm:$0xff]  ;;  %s915_s16 = scalar_lea.hbm %s1763_s5, %s1169_s15 }
  0x2b   : > { %v445_v39 = vld [vmem:[%s1561_s29 + $0x70] sm:$0xff]  ;;  %v446_v43 = vld [vmem:[%s1561_s29 + $0x78] sm:$0xff]  ;;  %v720_v47 = vld [vmem:[%s1555_s27 + $0x60] sm:$0xff]  ;;  %s918_s30 = sshll.u32 %s915_s16, 4  ;;  %s919_s30 = int_to_ptr.hbm [resolvable:$true] %s918_s30 }
  0x2c   : > { %1180 = vmatpush.msrb.mxu3 %v448_v11  ;;  %v458_v40 = vld [vmem:[%s1536_s8 + $0x30] sm:$0xff]  ;;  %v459_v44 = vld [vmem:[%s1536_s8 + $0x38] sm:$0xff]  ;;  %v460_v48 = vld [vmem:[%s1536_s8 + $0x40] sm:$0xff] }
  0x2d   : > { %1124 = vmatmul.msk.f32.gmra.mxu3 %vm474_vm1, %v465_v18  ;;  %v714_v41 = vld [vmem:[%s1555_s27 + $0x30] sm:$0xff]  ;;  %v715_v45 = vld [vmem:[%s1555_s27 + $0x38] sm:$0xff]  ;;  %v716_v49 = vld [vmem:[%s1555_s27 + $0x40] sm:$0xff] }
  0x2e   : > { %1181 = vmatpush.msrb.mxu3 %v447_v14  ;;  %v437_v42 = vld [vmem:[%s1561_s29 + $0x30] sm:$0xff]  ;;  %v438_v46 = vld [vmem:[%s1561_s29 + $0x38] sm:$0xff]  ;;  %v439_v50 = vld [vmem:[%s1561_s29 + $0x40] sm:$0xff] }
  0x2f   : > { %1112 = vmatmul.msk.f32.gmra.mxu0 %vm474_vm1, %v453_v20  ;;  %1151 = vmatmul.msk.f32.gmra.mxu2 %vm474_vm1, %v709_v21  ;;  %v721_v51 = vld [vmem:[%s1555_s27 + $0x68] sm:$0xff]  ;;  %v722_v55 = vld [vmem:[%s1555_s27 + $0x70] sm:$0xff]  ;;  %v723_v59 = vld [vmem:[%s1555_s27 + $0x78] sm:$0xff] }
  0x30   : > { %1182 = vmatpush.msk.msra.mxu3 %vm523_vm0, %v1467_v1  ;;  %1129 = vmatmul.msk.f32.gmra.mxu1 %vm474_vm1, %v432_v22  ;;  %v461_v52 = vld [vmem:[%s1536_s8 + $0x48] sm:$0xff]  ;;  %v462_v56 = vld [vmem:[%s1536_s8 + $0x50] sm:$0xff]  ;;  %v463_v60 = vld [vmem:[%s1536_s8 + $0x58] sm:$0xff]  ;;  %s1282_s8 = scalar_lea.hbm %s1763_s5, 1024 }
  0x31   : > { %v717_v53 = vld [vmem:[%s1555_s27 + $0x48] sm:$0xff]  ;;  %v718_v57 = vld [vmem:[%s1555_s27 + $0x50] sm:$0xff]  ;;  %v719_v61 = vld [vmem:[%s1555_s27 + $0x58] sm:$0xff]  ;;  %s1276_s27 = sshra.s32 %s919_s30, 4  ;;  %s1277_s27 = int_to_ptr.hbm [resolvable:$true] %s1276_s27 }
  0x32   : > { %1183 = vmatpush.msra.mxu3 %v1478_v3  ;;  %v440_v54 = vld [vmem:[%s1561_s29 + $0x48] sm:$0xff]  ;;  %v441_v58 = vld [vmem:[%s1561_s29 + $0x50] sm:$0xff]  ;;  %v442_v62 = vld [vmem:[%s1561_s29 + $0x58] sm:$0xff]  ;;  %s1671_s29 = scalar_lea.vmem [#allocation2], %s1098_s3  ;;  %s1278_s17 = scalar_lea.hbm %s1277_s27, 128 }
  0x33   : > { %v1666_v4 = vld [vmem:[%s1762_s4] ss:$0 sm:$0xff]  ;;  %s916_s26 = sshll.u32 %s1671_s29, 4  ;;  %p1279_p2 = scmp.ne.s32.totalorder %s1277_s27, %s1278_s17  ;;  %s917_s26 = int_to_ptr.vmem [resolvable:$true] %s916_s26 }
  0x34   : > { %1184 = vmatpush.msra.mxu3 %v1493_v6  ;;  %p1283_p6 = scmp.lt.s32.totalorder %s1277_s27, %s1763_s5  ;;  %p1284_p7 = scmp.lt.s32.totalorder %s1282_s8, %s1278_s17 }
  0x35   : > { %1125 = vmatmul.msk.f32.gmra.mxu3 %vm474_vm1, %v466_v23  ;;  %p1280_p4 = pnand %p1279_p2, %p1441_p3 }
  0x36   : > { %1185 = vmatpush.msra.mxu3 %v1145_v10  ;;  %p1285_p9 = por %p1284_p7, %p1283_p6 }
  0x37   : > { %1113 = vmatmul.msk.f32.gmra.mxu0 %vm474_vm1, %v454_v24  ;;  %1152 = vmatmul.msk.f32.gmra.mxu2 %vm474_vm1, %v710_v25  ;;  %p1281_p5 = pneg %p1280_p4 }
  0x38   : > { %1186 = vmatpush.msra.mxu3 %v1144_v13  ;;  %1130 = vmatmul.msk.f32.gmra.mxu1 %vm474_vm1, %v433_v26 }
  0x39   : > { %p1286_p10 = pnand %p1285_p9, %p1281_p5 }
  0x3d   : > { %1126 = vmatmul.msk.f32.gmra.mxu3 %vm474_vm1, %v467_v27 }
  0x3f   : > { %1114 = vmatmul.msk.f32.gmra.mxu0 %vm474_vm1, %v455_v28  ;;  %1153 = vmatmul.msk.f32.gmra.mxu2 %vm474_vm1, %v711_v29 }
  0x40   : > { %1131 = vmatmul.msk.f32.gmra.mxu1 %vm474_vm1, %v434_v30 }
  0x45   : > { %1140 = vmatmul.msk.f32.vlgmr.msrb.gmra.mxu3 %vm474_vm1, %v443_v31 }
  0x47   : > { %1115 = vmatmul.msk.f32.gmra.mxu0 %vm474_vm1, %v456_v32  ;;  %1154 = vmatmul.msk.f32.gmra.mxu2 %vm474_vm1, %v712_v33 }
  0x48   : > { %1132 = vmatmul.msk.f32.gmra.mxu1 %vm474_vm1, %v435_v34 }
  0x4d   : > { %1141 = vmatmul.msk.f32.gmra.mxu3 %vm474_vm1, %v444_v35 }
  0x4f   : > { %1116 = vmatmul.msk.f32.gmra.mxu0 %vm474_vm1, %v457_v36  ;;  %1155 = vmatmul.msk.f32.gmra.mxu2 %vm474_vm1, %v713_v37 }
  0x50   : > { %1133 = vmatmul.msk.f32.gmra.mxu1 %vm474_vm1, %v436_v38 }
  0x55   : > { %1142 = vmatmul.msk.f32.gmra.mxu3 %vm474_vm1, %v445_v39 }
  0x57   : > { %1117 = vmatmul.msk.f32.gmra.mxu0 %vm474_vm1, %v458_v40  ;;  %1156 = vmatmul.msk.f32.gmra.mxu2 %vm474_vm1, %v714_v41 }
  0x58   : > { %1134 = vmatmul.msk.f32.gmra.mxu1 %vm474_vm1, %v437_v42 }
  0x5d   : > { %1143 = vmatmul.msk.f32.gmra.mxu3 %vm474_vm1, %v446_v43 }
  0x5f   : > { %1118 = vmatmul.msk.f32.gmra.mxu0 %vm474_vm1, %v459_v44  ;;  %1157 = vmatmul.msk.f32.gmra.mxu2 %vm474_vm1, %v715_v45 }
  0x60   : > { %1135 = vmatmul.msk.f32.gmra.mxu1 %vm474_vm1, %v438_v46 }
  0x65   : > { %1162 = vmatmul.msk.f32.vlgmr.msra.gmra.mxu3 %vm474_vm1, %v720_v47 }
  0x67   : > { %1119 = vmatmul.msk.f32.gmra.mxu0 %vm474_vm1, %v460_v48  ;;  %1158 = vmatmul.msk.f32.gmra.mxu2 %vm474_vm1, %v716_v49 }
  0x68   : > { %1136 = vmatmul.msk.f32.gmra.mxu1 %vm474_vm1, %v439_v50 }
  0x6d   : > { %1163 = vmatmul.msk.f32.gmra.mxu3 %vm474_vm1, %v721_v51 }
  0x6f   : > { %1120 = vmatmul.msk.f32.gmra.mxu0 %vm474_vm1, %v461_v52  ;;  %1159 = vmatmul.msk.f32.gmra.mxu2 %vm474_vm1, %v717_v53 }
  0x70   : > { %1137 = vmatmul.msk.f32.gmra.mxu1 %vm474_vm1, %v440_v54 }
  0x75   : > { %1164 = vmatmul.msk.f32.gmra.mxu3 %vm474_vm1, %v722_v55 }
  0x77   : > { %1121 = vmatmul.msk.f32.gmra.mxu0 %vm474_vm1, %v462_v56  ;;  %1160 = vmatmul.msk.f32.gmra.mxu2 %vm474_vm1, %v718_v57 }
  0x78   : > { %1138 = vmatmul.msk.f32.gmra.mxu1 %vm474_vm1, %v441_v58 }
  0x7d   : > { %1165 = vmatmul.msk.f32.gmra.mxu3 %vm474_vm1, %v723_v59 }
  0x7f   : > { %1122 = vmatmul.msk.f32.gmra.mxu0 %vm474_vm1, %v463_v60  ;;  %1161 = vmatmul.msk.f32.gmra.mxu2 %vm474_vm1, %v719_v61 }
  0x80   : > { %1139 = vmatmul.msk.f32.gmra.mxu1 %vm474_vm1, %v442_v62 }
  0xa4   : > { %v544_v63 = vpop.f32.mrf.mxu0 }
  0xa5   : > { %v660_v1 = vpop.f32.mrf.mxu1 }
  0xa6   : > { %v661_v2 = vadd.f32 %v660_v1, %v544_v63 }
  0xa8   : > { %v1658_v0 = vpop.f32.mrf.mxu3 }
  0xaa   : > { %v798_v5 = vpop.f32.mrf.mxu2 }
  0xab   : > { %v846_v6 = vadd.f32 %v798_v5, %v661_v2 }
  0xac   : > { %v547_v3 = vpop.f32.mrf.mxu0 }
  0xad   : > { %v866_v8 = vadd.f32 %v1666_v4, %v846_v6  ;;  %v663_v9 = vpop.f32.mrf.mxu1 }
  0xae   : > { %v664_v10 = vadd.f32 %v663_v9, %v547_v3 }
  0xaf   : > { %882 = vst [vmem:[%s1671_s29] sm:$0xff] %v866_v8 }
  0xb0   : > { %v1668_v7 = vpop.f32.mrf.mxu3 }
  0xb2   : > { %v801_v12 = vpop.f32.mrf.mxu2 }
  0xb3   : > { %v847_v13 = vadd.f32 %v801_v12, %v664_v10 }
  0xb4   : > { %v550_v11 = vpop.f32.mrf.mxu0 }
  0xb5   : > { %v867_v15 = vadd.f32 %v1666_v4, %v847_v13  ;;  %v666_v16 = vpop.f32.mrf.mxu1 }
  0xb6   : > { %v667_v17 = vadd.f32 %v666_v16, %v550_v11 }
  0xb7   : > { %883 = vst [vmem:[%s1671_s29 + $0x8] sm:$0xff] %v867_v15 }
  0xb8   : > { %v1674_v14 = vpop.f32.mrf.mxu3 }
  0xba   : > { %v804_v19 = vpop.f32.mrf.mxu2 }
  0xbb   : > { %v848_v20 = vadd.f32 %v804_v19, %v667_v17 }
  0xbc   : > { %v553_v18 = vpop.f32.mrf.mxu0 }
  0xbd   : > { %v868_v22 = vadd.f32 %v1666_v4, %v848_v20  ;;  %v669_v23 = vpop.f32.mrf.mxu1 }
  0xbe   : > { %v670_v24 = vadd.f32 %v669_v23, %v553_v18 }
  0xbf   : > { %884 = vst [vmem:[%s1671_s29 + $0x10] sm:$0xff] %v868_v22 }
  0xc0   : > { %v1678_v21 = vpop.f32.mrf.mxu3 }
  0xc2   : > { %v807_v26 = vpop.f32.mrf.mxu2 }
  0xc3   : > { %v849_v27 = vadd.f32 %v807_v26, %v670_v24 }
  0xc4   : > { %v556_v25 = vpop.f32.mrf.mxu0 }
  0xc5   : > { %v869_v29 = vadd.f32 %v1666_v4, %v849_v27  ;;  %v672_v30 = vpop.f32.mrf.mxu1 }
  0xc6   : > { %v673_v31 = vadd.f32 %v672_v30, %v556_v25 }
  0xc7   : > { %885 = vst [vmem:[%s1671_s29 + $0x18] sm:$0xff] %v869_v29 }
  0xc8   : > { %v696_v28 = vpop.f32.mrf.mxu3 }
  0xc9   : > { %v697_v55 = vadd.f32 %v696_v28, %v1658_v0 }
  0xca   : > { %v810_v33 = vpop.f32.mrf.mxu2 }
  0xcb   : > { %v850_v34 = vadd.f32 %v810_v33, %v673_v31 }
  0xcc   : > { %v559_v32 = vpop.f32.mrf.mxu0 }
  0xcd   : > { %v870_v36 = vadd.f32 %v1666_v4, %v850_v34  ;;  %v675_v37 = vpop.f32.mrf.mxu1 }
  0xce   : > { %v676_v38 = vadd.f32 %v675_v37, %v559_v32 }
  0xcf   : > { %886 = vst [vmem:[%s1671_s29 + $0x20] sm:$0xff] %v870_v36 }
  0xd0   : > { %v699_v35 = vpop.f32.mrf.mxu3 }
  0xd1   : > { %v700_v2 = vadd.f32 %v699_v35, %v1668_v7 }
  0xd2   : > { %v813_v40 = vpop.f32.mrf.mxu2 }
  0xd3   : > { %v851_v41 = vadd.f32 %v813_v40, %v676_v38 }
  0xd4   : > { %v562_v39 = vpop.f32.mrf.mxu0 }
  0xd5   : > { %v871_v43 = vadd.f32 %v1666_v4, %v851_v41  ;;  %v678_v44 = vpop.f32.mrf.mxu1 }
  0xd6   : > { %v679_v45 = vadd.f32 %v678_v44, %v562_v39 }
  0xd7   : > { %887 = vst [vmem:[%s1671_s29 + $0x28] sm:$0xff] %v871_v43 }
  0xd8   : > { %v702_v42 = vpop.f32.mrf.mxu3 }
  0xd9   : > { %v703_v13 = vadd.f32 %v702_v42, %v1674_v14 }
  0xda   : > { %v816_v47 = vpop.f32.mrf.mxu2 }
  0xdb   : > { %v852_v48 = vadd.f32 %v816_v47, %v679_v45 }
  0xdc   : > { %v565_v46 = vpop.f32.mrf.mxu0 }
  0xdd   : > { %v872_v50 = vadd.f32 %v1666_v4, %v852_v48  ;;  %v681_v51 = vpop.f32.mrf.mxu1 }
  0xde   : > { %v682_v52 = vadd.f32 %v681_v51, %v565_v46 }
  0xdf   : > { %888 = vst [vmem:[%s1671_s29 + $0x30] sm:$0xff] %v872_v50 }
  0xe0   : > { %v705_v49 = vpop.f32.mrf.mxu3 }
  0xe1   : > { %v706_v14 = vadd.f32 %v705_v49, %v1678_v21 }
  0xe2   : > { %v819_v54 = vpop.f32.mrf.mxu2 }
  0xe3   : > { %v853_v56 = vadd.f32 %v819_v54, %v682_v52 }
  0xe4   : > { %v568_v53 = vpop.f32.mrf.mxu0 }
  0xe5   : > { %v873_v58 = vadd.f32 %v1666_v4, %v853_v56  ;;  %v684_v59 = vpop.f32.mrf.mxu1 }
  0xe6   : > { %v685_v61 = vadd.f32 %v684_v59, %v568_v53 }
  0xe7   : > { %889 = vst [vmem:[%s1671_s29 + $0x38] sm:$0xff] %v873_v58 }
  0xe8   : > { %v834_v57 = vpop.f32.mrf.mxu3 }
  0xe9   : > { %v858_v60 = vadd.f32 %v834_v57, %v697_v55 }
  0xea   : > { %v822_v1 = vpop.f32.mrf.mxu2 }
  0xeb   : > { %v878_v62 = vadd.f32 %v1666_v4, %v858_v60  ;;  %v854_v3 = vadd.f32 %v822_v1, %v685_v61 }
  0xec   : > { %v571_v63 = vpop.f32.mrf.mxu0 }
  0xed   : > { %894 = vst [vmem:[%s1671_s29 + $0x60] sm:$0xff] %v878_v62  ;;  %v874_v0 = vadd.f32 %v1666_v4, %v854_v3  ;;  %v687_v6 = vpop.f32.mrf.mxu1 }
  0xee   : > { %v688_v9 = vadd.f32 %v687_v6, %v571_v63 }
  0xef   : > { %890 = vst [vmem:[%s1671_s29 + $0x40] sm:$0xff] %v874_v0 }
  0xf0   : > { %v837_v5 = vpop.f32.mrf.mxu3 }
  0xf1   : > { %v859_v8 = vadd.f32 %v837_v5, %v700_v2 }
  0xf2   : > { %v825_v11 = vpop.f32.mrf.mxu2 }
  0xf3   : > { %v879_v10 = vadd.f32 %v1666_v4, %v859_v8  ;;  %v855_v7 = vadd.f32 %v825_v11, %v688_v9 }
  0xf4   : > { %v574_v12 = vpop.f32.mrf.mxu0 }
  0xf5   : > { %895 = vst [vmem:[%s1671_s29 + $0x68] sm:$0xff] %v879_v10  ;;  %v875_v16 = vadd.f32 %v1666_v4, %v855_v7  ;;  %v690_v17 = vpop.f32.mrf.mxu1 }
  0xf6   : > { %v691_v19 = vadd.f32 %v690_v17, %v574_v12 }
  0xf7   : > { %891 = vst [vmem:[%s1671_s29 + $0x48] sm:$0xff] %v875_v16 }
  0xf8   : > { %v840_v15 = vpop.f32.mrf.mxu3 }
  0xf9   : > { %v860_v18 = vadd.f32 %v840_v15, %v703_v13 }
  0xfa   : > { %v828_v22 = vpop.f32.mrf.mxu2 }
  0xfb   : > { %v880_v20 = vadd.f32 %v1666_v4, %v860_v18  ;;  %v856_v23 = vadd.f32 %v828_v22, %v691_v19 }
  0xfc   : > { %v577_v24 = vpop.f32.mrf.mxu0 }
  0xfd   : > { %896 = vst [vmem:[%s1671_s29 + $0x70] sm:$0xff] %v880_v20  ;;  %v876_v26 = vadd.f32 %v1666_v4, %v856_v23  ;;  %v693_v27 = vpop.f32.mrf.mxu1 }
  0xfe   : > { %v694_v29 = vadd.f32 %v693_v27, %v577_v24 }
  0xff   : > { %892 = vst [vmem:[%s1671_s29 + $0x50] sm:$0xff] %v876_v26 }
 0x100   : > { %v843_v25 = vpop.f32.mrf.mxu3 }
 0x101   : > { %v861_v28 = vadd.f32 %v843_v25, %v706_v14 }
 0x102   : > { %v831_v21 = vpop.f32.mrf.mxu2 }
 0x103   : > { %v881_v30 = vadd.f32 %v1666_v4, %v861_v28  ;;  %v857_v31 = vadd.f32 %v831_v21, %v694_v29 }
 0x105   : > { %897 = vst [vmem:[%s1671_s29 + $0x78] sm:$0xff] %v881_v30  ;;  %v877_v32 = vadd.f32 %v1666_v4, %v857_v31 }
 0x107   : > { %893 = vst [vmem:[%s1671_s29 + $0x58] sm:$0xff] %v877_v32 }
 0x108   : > { %1289 = shalt.err (!%p1286_p10)
}
 0x109   : > { %s1358_s1 = smov 128   ;;  %s1359_s29 = smov 8  }
 0x10a   : > { %1188 = dma.vmem_to_hbm [thread:$0]  (%p1441_p3), %s917_s26, 2048, %s919_s30, %s899_s9, %s1358_s1, %s1358_s1, %s1359_s29  }
 0x10b PF: > { %p1194_p11 = scmp.ge.s32.totalorder %s1356_s25, 2  ;;  %s933_s13 = sand.u32 1, %s1328_s18  }
 0x10c   : > { %s934_s15 = scalar_lea.sflag [#allocation3], %s933_s13 }
 0x10d   : > { %p1191_p12 = pnand %p1194_p11, %p1450_p8 }
 0x10f   : > { %p1192_p13 = pneg %p1191_p12 }
 0x111   : > { %1323 = dma.done.wait (%p1192_p13), %s934_s15, 2048  }
 0x112   : > { %1325 = vsyncadd (%p1192_p13), %s934_s15, 4294965248  ;;  %s18_s25 = sadd.s32 1, %s1356_s25   ;;  %s1773_s6 = sld [smem:[#allocation5_spill]] }
 0x113   : > { %p15_p0 = scmp.ge.s32.totalorder %s18_s25, 10   ;;  %s1774_s18 = smov %s1332_s19 }
 0x114   : > { %s1775_s19 = smov %s1336_s20  ;;  %s1776_s20 = smov %s1459_s11 }
 0x115   : > { %s1777_s21 = smov %s1348_s23  ;;  %s1778_s22 = smov %s1352_s24 }
 0x116   : > { %s1779_s23 = smov %s1782_s28  ;;  %17 = sbr.rel (!%p15_p0) target bundleno = 8 (0x8), region = 89 }
 0x118   : > { %s1780_s24 = smov %s1773_s6 }
 0x11b   :  { %940 = vsyncpa [#allocation3], 1 }
 0x11c   :  { %942 = vsyncpa [#allocation3 + $0x1], 1 }

</bundles_post_ra>
